<compile_context>
chip_gen: v5e
topology: v5e:2x2
jax: 0.10.0
libtpu: 0.0.40
codegen_flags: <defaults>
</compile_context>

<pallas_src>
import functools
import math

import jax
import jax.numpy as jnp
from jax.experimental import pallas as pl
from jax.experimental.pallas import tpu as pltpu


def _round_up(x, m):
    return (x + m - 1) // m * m


def _l2_normalize(x):
    # F.normalize(x, p=2, dim=-1): x / max(||x||, 1e-12) == x * rsqrt(max(ssq, 1e-24))
    ssq = jnp.sum(x * x, axis=-1, keepdims=True)
    return x * jax.lax.rsqrt(jnp.maximum(ssq, 1e-24))


def _simclr_lse_kernel(zq_ref, zk_ref, lse_ref, m_sc, l_sc,
                       *, n_valid, tq, tk, has_pad):
    i = pl.program_id(0)   # query-row block ("parallel")
    k = pl.program_id(1)   # key-column block ("arbitrary", online-LSE axis)

    @pl.when(k == 0)
    def _init():
        m_sc[...] = jnp.full(m_sc.shape, -1e30, jnp.float32)
        l_sc[...] = jnp.zeros(l_sc.shape, jnp.float32)

    # (tq, tk) logits tile on the MXU: bf16 operands straight from the refs
    # (pre-normalised; query side pre-scaled by 1/temperature), f32 accumulate.
    s = jax.lax.dot_general(
        zq_ref[...], zk_ref[...],
        dimension_numbers=(((1,), (1,)), ((), ())),
        preferred_element_type=jnp.float32)

    def _online_lse(s_blk):
        m_prev = m_sc[...]
        m_new = jnp.maximum(m_prev, jnp.max(s_blk, axis=-1, keepdims=True))
        l_sc[...] = (l_sc[...] * jnp.exp(m_prev - m_new)
                     + jnp.sum(jnp.exp(s_blk - m_new), axis=-1, keepdims=True))
        m_sc[...] = m_new

    # The diagonal of this row block falls in exactly one key block (tq | tk);
    # padded key columns exist only in the last key block.  Gate the mask build
    # (2x iota + compares + where over the full tile) to those steps only.
    q0 = i * tq
    need_mask = jnp.logical_and(q0 >= k * tk, q0 < (k + 1) * tk)
    if has_pad:
        need_mask = jnp.logical_or(need_mask, k == pl.num_programs(1) - 1)

    @pl.when(need_mask)
    def _masked():
        grow = q0 + jax.lax.broadcasted_iota(jnp.int32, (tq, tk), 0)
        gcol = k * tk + jax.lax.broadcasted_iota(jnp.int32, (tq, tk), 1)
        bad = grow == gcol                       # self-similarity
        if has_pad:
            bad = jnp.logical_or(bad, gcol >= n_valid)   # padded key columns
        _online_lse(jnp.where(bad, jnp.float32(-1e30), s))

    @pl.when(jnp.logical_not(need_mask))
    def _plain():
        _online_lse(s)

    @pl.when(k == pl.num_programs(1) - 1)
    def _finalize():
        lse_ref[...] = jnp.log(l_sc[...]) + m_sc[...]


def simclr_loss(z_i, z_j, *, temperature=1.0, normalize=True,
                block_q=512, block_k=1024):
    assert z_i.shape == z_j.shape and z_i.ndim == 2
    assert block_q % 16 == 0 and block_k % 128 == 0
    B, D = z_i.shape
    N = 2 * B
    inv_t = jnp.float32(1.0 / temperature)

    z_i = z_i.astype(jnp.float32)
    z_j = z_j.astype(jnp.float32)
    if normalize:
        z_i = _l2_normalize(z_i)
        z_j = _l2_normalize(z_j)

    # Positive logit per row (row-wise dot of the paired views), f32, in JAX.
    pos_half = jnp.sum(z_i * z_j, axis=-1) * inv_t          # (B,)
    pos = jnp.concatenate([pos_half, pos_half])              # (2B,)

    z = jnp.concatenate([z_i, z_j], axis=0)                  # keys   (2B, D)
    zq = z * inv_t                                           # queries, 1/t folded in

    # Tile sizes: lane-dense key tiles (tk % 128 == 0); row tiles a multiple of
    # 16 (bf16 sublane packing) that divides tk, so padding is a tk-multiple.
    tk = min(block_k, _round_up(N, 128))
    tq = math.gcd(min(block_q, tk), tk)
    Np = _round_up(N, tk)
    if Np // tq < 2:
        tq = Np // 2          # keep >=2 row blocks so both v7x TCs get work
    Dp = _round_up(D, 128)
    has_pad = Np > N

    pad_bf16 = lambda a: jnp.pad(a, ((0, Np - N), (0, Dp - D))).astype(jnp.bfloat16)
    zq_b = pad_bf16(zq)
    zk_b = pad_bf16(z)

    grid = (Np // tq, Np // tk)

    # VMEM budget: double-buffered bf16 input tiles + output + m/l scratch +
    # f32 logits/exp temporaries, with 2x headroom, capped below physical VMEM.
    est = (2 * 2 * (tq * Dp + tk * Dp)   # double-buffered bf16 input tiles
           + 4 * 4 * tq                  # output + m/l scratch (f32)
           + 4 * 4 * tq * tk)            # s / exp / mask temporaries (f32)
    try:
        phys = int(pltpu.get_tpu_info().vmem_capacity_bytes)
    except Exception:
        phys = 128 * 2 ** 20
    vmem_limit = int(min((phys * 3) // 4, max(32 * 2 ** 20, 2 * est)))

    kernel = functools.partial(
        _simclr_lse_kernel, n_valid=N, tq=tq, tk=tk, has_pad=has_pad)

    lse = pl.pallas_call(
        kernel,
        out_shape=jax.ShapeDtypeStruct((Np, 1), jnp.float32),
        grid_spec=pltpu.PrefetchScalarGridSpec(
            num_scalar_prefetch=0,
            grid=grid,
            in_specs=[
                pl.BlockSpec((tq, Dp), lambda i, k: (i, 0)),   # query rows (bf16)
                pl.BlockSpec((tk, Dp), lambda i, k: (k, 0)),   # key rows   (bf16)
            ],
            out_specs=pl.BlockSpec((tq, 1), lambda i, k: (i, 0)),
            scratch_shapes=[pltpu.VMEM((tq, 1), jnp.float32)] * 2,   # m, l
        ),
        compiler_params=pltpu.CompilerParams(
            dimension_semantics=("parallel", "arbitrary"),
            vmem_limit_bytes=vmem_limit,
        ),
    )(zq_b, zk_b)

    # Cross-entropy with labels == 0: loss_r = LSE(row) - pos_r; mean over 2B rows.
    return jnp.sum(lse[:N, 0] - pos) / jnp.float32(N)


def _simclr_loss_ref(z_i, z_j, *, temperature=1.0, normalize=True):
    """Pure-JAX f32 reference mirroring the PyTorch module."""
    if normalize:
        z_i = z_i / jnp.maximum(jnp.linalg.norm(z_i, axis=-1, keepdims=True), 1e-12)
        z_j = z_j / jnp.maximum(jnp.linalg.norm(z_j, axis=-1, keepdims=True), 1e-12)
    B = z_i.shape[0]
    t = temperature
    aa = z_i @ z_i.T / t
    bb = z_j @ z_j.T / t
    ab = z_i @ z_j.T / t
    ba = z_j @ z_i.T / t
    mask = ~jnp.eye(B, dtype=bool)
    off = lambda m: m[mask].reshape(B, B - 1)
    pos = jnp.concatenate([jnp.diag(ab), jnp.diag(ba)])[:, None]
    neg_a = jnp.concatenate([off(aa), off(ab)], axis=1)
    neg_b = jnp.concatenate([off(ba), off(bb)], axis=1)
    neg = jnp.concatenate([neg_a, neg_b], axis=0)
    logits = jnp.concatenate([pos, neg], axis=1)
    logp = jax.nn.log_softmax(logits, axis=-1)
    return -jnp.mean(logp[:, 0])


if __name__ == "__main__":
    key = jax.random.PRNGKey(0)
    k1, k2, k3, k4 = jax.random.split(key, 4)

    # Small shapes: single key block, two row blocks (grid (2, 1)).
    B1, D = 8, 32
    z_i = jax.random.normal(k1, (B1, D), dtype=jnp.float32)
    z_j = jax.random.normal(k2, (B1, D), dtype=jnp.float32)
    loss = jax.block_until_ready(simclr_loss(z_i, z_j, temperature=0.5))
    ref = _simclr_loss_ref(z_i, z_j, temperature=0.5)
    assert jnp.allclose(loss, ref, atol=2e-2, rtol=2e-2), (loss, ref)

    # Multi-block path: grid (2, 2) with padded key columns + gated diag mask.
    B2 = 80
    z_i2 = jax.random.normal(k3, (B2, D), dtype=jnp.float32)
    z_j2 = jax.random.normal(k4, (B2, D), dtype=jnp.float32)
    loss2 = jax.block_until_ready(
        simclr_loss(z_i2, z_j2, temperature=0.5, block_q=128, block_k=128))
    ref2 = _simclr_loss_ref(z_i2, z_j2, temperature=0.5)
    assert jnp.allclose(loss2, ref2, atol=2e-2, rtol=2e-2), (loss2, ref2)

    # Low-temperature check (bf16 MXU logits scaled by 1/t = 10), default tiles.
    loss3 = jax.block_until_ready(simclr_loss(z_i2, z_j2, temperature=0.1))
    ref3 = _simclr_loss_ref(z_i2, z_j2, temperature=0.1)
    assert jnp.allclose(loss3, ref3, atol=5e-2, rtol=2e-2), (loss3, ref3)

    print("KERNEL_OK")
</pallas_src>

<mosaic_0001>
module attributes {stable_mosaic.version = 11 : i64} {
  func.func @_simclr_lse_kernel(%arg0: i32, %arg1: i32, %arg2: memref<64x128xbf16, #tpu.memory_space<vmem>>, %arg3: memref<128x128xbf16, #tpu.memory_space<vmem>>, %arg4: memref<64x1xf32, #tpu.memory_space<vmem>>, %arg5: memref<64x1xf32, #tpu.memory_space<vmem>>, %arg6: memref<64x1xf32, #tpu.memory_space<vmem>>) attributes {dimension_semantics = [#tpu.dimension_semantics<parallel>, #tpu.dimension_semantics<arbitrary>], iteration_bounds = array<i64: 2, 1>, scalar_prefetch = 0 : i64, scratch_operands = 2 : i64, tpu.core_type = #tpu.core_type<tc>, window_params = [{transform_indices = @transform_0, window_bounds = array<i64: 64, 128>}, {transform_indices = @transform_1, window_bounds = array<i64: 128, 128>}, {transform_indices = @transform_2, window_bounds = array<i64: 64, 1>}]} {
    %c0_i32 = arith.constant 0 : i32
    %0 = arith.cmpi eq, %arg1, %c0_i32 : i32
    %1 = arith.extui %0 : i1 to i32
    %c0_i32_0 = arith.constant 0 : i32
    %2 = arith.cmpi ne, %1, %c0_i32_0 : i32
    scf.if %2 {
      %cst_10 = arith.constant -1.000000e+30 : f32
      %23 = vector.broadcast %cst_10 : f32 to vector<64x1xf32>
      %c0_11 = arith.constant 0 : index
      %c0_12 = arith.constant 0 : index
      %24 = vector.load %arg5[%c0_11, %c0_12] : memref<64x1xf32, #tpu.memory_space<vmem>>, vector<64x1xf32>
      tpu.vector_store %arg5[%c0_11, %c0_12], %23 {strides = array<i32>} : memref<64x1xf32, #tpu.memory_space<vmem>>, vector<64x1xf32>,
      %cst_13 = arith.constant 0.000000e+00 : f32
      %25 = vector.broadcast %cst_13 : f32 to vector<64x1xf32>
      %c0_14 = arith.constant 0 : index
      %c0_15 = arith.constant 0 : index
      %26 = vector.load %arg6[%c0_14, %c0_15] : memref<64x1xf32, #tpu.memory_space<vmem>>, vector<64x1xf32>
      tpu.vector_store %arg6[%c0_14, %c0_15], %25 {strides = array<i32>} : memref<64x1xf32, #tpu.memory_space<vmem>>, vector<64x1xf32>,
    } else {
    }
    %c0 = arith.constant 0 : index
    %c0_1 = arith.constant 0 : index
    %3 = vector.load %arg2[%c0, %c0_1] : memref<64x128xbf16, #tpu.memory_space<vmem>>, vector<64x128xbf16>
    %c0_2 = arith.constant 0 : index
    %c0_3 = arith.constant 0 : index
    %4 = vector.load %arg3[%c0_2, %c0_3] : memref<128x128xbf16, #tpu.memory_space<vmem>>, vector<128x128xbf16>
    %cst = arith.constant dense<0.000000e+00> : vector<64x128xf32>
    %5 = tpu.matmul %3, %4, %cst {dimension_numbers = #tpu.dot_dimension_numbers<[1], [1], [0], [0], [0, 0, 1, 0], [], []>} : vector<64x128xbf16>, vector<128x128xbf16>, vector<64x128xf32> -> vector<64x128xf32>
    %c64_i32 = arith.constant 64 : i32
    %6 = arith.muli %arg0, %c64_i32 : i32
    %c128_i32 = arith.constant 128 : i32
    %7 = arith.muli %arg1, %c128_i32 : i32
    %8 = arith.cmpi sge, %6, %7 : i32
    %c1_i32 = arith.constant 1 : i32
    %9 = arith.addi %arg1, %c1_i32 : i32
    %c128_i32_4 = arith.constant 128 : i32
    %10 = arith.muli %9, %c128_i32_4 : i32
    %11 = arith.cmpi slt, %6, %10 : i32
    %12 = arith.andi %8, %11 : i1
    %c0_i32_5 = arith.constant 0 : i32
    %13 = arith.cmpi eq, %arg1, %c0_i32_5 : i32
    %14 = arith.ori %12, %13 : i1
    %15 = arith.extui %14 : i1 to i32
    %c0_i32_6 = arith.constant 0 : i32
    %16 = arith.cmpi ne, %15, %c0_i32_6 : i32
    scf.if %16 {
      %23 = tpu.iota {dimensions = array<i32: 0>} : vector<64x128xi32>
      %24 = vector.broadcast %6 : i32 to vector<64x128xi32>
      %25 = arith.addi %24, %23 : vector<64x128xi32>
      %c128_i32_10 = arith.constant 128 : i32
      %26 = arith.muli %arg1, %c128_i32_10 : i32
      %27 = tpu.iota {dimensions = array<i32: 1>} : vector<64x128xi32>
      %28 = vector.broadcast %26 : i32 to vector<64x128xi32>
      %29 = arith.addi %28, %27 : vector<64x128xi32>
      %30 = arith.cmpi eq, %25, %29 : vector<64x128xi32>
      %c16_i32 = arith.constant 16 : i32
      %31 = vector.broadcast %c16_i32 : i32 to vector<64x128xi32>
      %32 = arith.cmpi sge, %29, %31 : vector<64x128xi32>
      %33 = arith.ori %30, %32 : vector<64x128xi1>
      %cst_11 = arith.constant -1.000000e+30 : f32
      %34 = vector.broadcast %cst_11 : f32 to vector<64x128xf32>
      %35 = arith.select %33, %34, %5 : vector<64x128xi1>, vector<64x128xf32>
      %c0_12 = arith.constant 0 : index
      %c0_13 = arith.constant 0 : index
      %36 = vector.load %arg5[%c0_12, %c0_13] : memref<64x1xf32, #tpu.memory_space<vmem>>, vector<64x1xf32>
      %cst_14 = arith.constant dense<0xFF800000> : vector<64xf32>
      %37 = vector.multi_reduction <maximumf>, %35, %cst_14 [1] : vector<64x128xf32> to vector<64xf32>
      %38 = vector.shape_cast %37 : vector<64xf32> to vector<64x1xf32>
      %39 = arith.maximumf %36, %38 : vector<64x1xf32>
      %c0_15 = arith.constant 0 : index
      %c0_16 = arith.constant 0 : index
      %40 = vector.load %arg6[%c0_15, %c0_16] : memref<64x1xf32, #tpu.memory_space<vmem>>, vector<64x1xf32>
      %41 = arith.subf %36, %39 : vector<64x1xf32>
      %42 = math.exp %41 : vector<64x1xf32>
      %43 = arith.mulf %40, %42 : vector<64x1xf32>
      %44 = vector.broadcast %39 : vector<64x1xf32> to vector<64x128xf32>
      %45 = arith.subf %35, %44 : vector<64x128xf32>
      %46 = math.exp %45 : vector<64x128xf32>
      %cst_17 = arith.constant dense<0.000000e+00> : vector<64xf32>
      %47 = vector.multi_reduction <add>, %46, %cst_17 [1] : vector<64x128xf32> to vector<64xf32>
      %48 = vector.shape_cast %47 : vector<64xf32> to vector<64x1xf32>
      %49 = arith.addf %43, %48 : vector<64x1xf32>
      %c0_18 = arith.constant 0 : index
      %c0_19 = arith.constant 0 : index
      %50 = vector.load %arg6[%c0_18, %c0_19] : memref<64x1xf32, #tpu.memory_space<vmem>>, vector<64x1xf32>
      tpu.vector_store %arg6[%c0_18, %c0_19], %49 {strides = array<i32>} : memref<64x1xf32, #tpu.memory_space<vmem>>, vector<64x1xf32>,
      %c0_20 = arith.constant 0 : index
      %c0_21 = arith.constant 0 : index
      %51 = vector.load %arg5[%c0_20, %c0_21] : memref<64x1xf32, #tpu.memory_space<vmem>>, vector<64x1xf32>
      tpu.vector_store %arg5[%c0_20, %c0_21], %39 {strides = array<i32>} : memref<64x1xf32, #tpu.memory_space<vmem>>, vector<64x1xf32>,
    } else {
    }
    %true = arith.constant true
    %17 = arith.xori %14, %true : i1
    %18 = arith.extui %17 : i1 to i32
    %c0_i32_7 = arith.constant 0 : i32
    %19 = arith.cmpi ne, %18, %c0_i32_7 : i32
    scf.if %19 {
      %c0_10 = arith.constant 0 : index
      %c0_11 = arith.constant 0 : index
      %23 = vector.load %arg5[%c0_10, %c0_11] : memref<64x1xf32, #tpu.memory_space<vmem>>, vector<64x1xf32>
      %cst_12 = arith.constant dense<0xFF800000> : vector<64xf32>
      %24 = vector.multi_reduction <maximumf>, %5, %cst_12 [1] : vector<64x128xf32> to vector<64xf32>
      %25 = vector.shape_cast %24 : vector<64xf32> to vector<64x1xf32>
      %26 = arith.maximumf %23, %25 : vector<64x1xf32>
      %c0_13 = arith.constant 0 : index
      %c0_14 = arith.constant 0 : index
      %27 = vector.load %arg6[%c0_13, %c0_14] : memref<64x1xf32, #tpu.memory_space<vmem>>, vector<64x1xf32>
      %28 = arith.subf %23, %26 : vector<64x1xf32>
      %29 = math.exp %28 : vector<64x1xf32>
      %30 = arith.mulf %27, %29 : vector<64x1xf32>
      %31 = vector.broadcast %26 : vector<64x1xf32> to vector<64x128xf32>
      %32 = arith.subf %5, %31 : vector<64x128xf32>
      %33 = math.exp %32 : vector<64x128xf32>
      %cst_15 = arith.constant dense<0.000000e+00> : vector<64xf32>
      %34 = vector.multi_reduction <add>, %33, %cst_15 [1] : vector<64x128xf32> to vector<64xf32>
      %35 = vector.shape_cast %34 : vector<64xf32> to vector<64x1xf32>
      %36 = arith.addf %30, %35 : vector<64x1xf32>
      %c0_16 = arith.constant 0 : index
      %c0_17 = arith.constant 0 : index
      %37 = vector.load %arg6[%c0_16, %c0_17] : memref<64x1xf32, #tpu.memory_space<vmem>>, vector<64x1xf32>
      tpu.vector_store %arg6[%c0_16, %c0_17], %36 {strides = array<i32>} : memref<64x1xf32, #tpu.memory_space<vmem>>, vector<64x1xf32>,
      %c0_18 = arith.constant 0 : index
      %c0_19 = arith.constant 0 : index
      %38 = vector.load %arg5[%c0_18, %c0_19] : memref<64x1xf32, #tpu.memory_space<vmem>>, vector<64x1xf32>
      tpu.vector_store %arg5[%c0_18, %c0_19], %26 {strides = array<i32>} : memref<64x1xf32, #tpu.memory_space<vmem>>, vector<64x1xf32>,
    } else {
    }
    %c0_i32_8 = arith.constant 0 : i32
    %20 = arith.cmpi eq, %arg1, %c0_i32_8 : i32
    %21 = arith.extui %20 : i1 to i32
    %c0_i32_9 = arith.constant 0 : i32
    %22 = arith.cmpi ne, %21, %c0_i32_9 : i32
    scf.if %22 {
      %c0_10 = arith.constant 0 : index
      %c0_11 = arith.constant 0 : index
      %23 = vector.load %arg6[%c0_10, %c0_11] : memref<64x1xf32, #tpu.memory_space<vmem>>, vector<64x1xf32>
      %24 = math.log %23 : vector<64x1xf32>
      %c0_12 = arith.constant 0 : index
      %c0_13 = arith.constant 0 : index
      %25 = vector.load %arg5[%c0_12, %c0_13] : memref<64x1xf32, #tpu.memory_space<vmem>>, vector<64x1xf32>
      %26 = arith.addf %24, %25 : vector<64x1xf32>
      %c0_14 = arith.constant 0 : index
      %c0_15 = arith.constant 0 : index
      %27 = vector.load %arg4[%c0_14, %c0_15] : memref<64x1xf32, #tpu.memory_space<vmem>>, vector<64x1xf32>
      tpu.vector_store %arg4[%c0_14, %c0_15], %26 {strides = array<i32>} : memref<64x1xf32, #tpu.memory_space<vmem>>, vector<64x1xf32>,
    } else {
    }
    return
  }
  func.func @transform_0(%arg0: i32, %arg1: i32) -> (i32, i32) {
    %c0_i32 = arith.constant 0 : i32
    %c0_i32_0 = arith.constant 0 : i32
    return %arg0, %c0_i32 : i32, i32
  }
  func.func @transform_1(%arg0: i32, %arg1: i32) -> (i32, i32) {
    %c0_i32 = arith.constant 0 : i32
    %c0_i32_0 = arith.constant 0 : i32
    return %arg1, %c0_i32 : i32, i32
  }
  func.func @transform_2(%arg0: i32, %arg1: i32) -> (i32, i32) {
    %c0_i32 = arith.constant 0 : i32
    %c0_i32_0 = arith.constant 0 : i32
    return %arg0, %c0_i32 : i32, i32
  }
}

</mosaic_0001>

<bundles_post_ra>
// kernel: tpu_custom_call.1
= control target key start
LH: loop header
LB: loop body
LE: loop exit
PB: predicated region body
PF: predicated region fallthrough
CT: control target
= control target key end

     0   :  { %7 = vsyncpa [#allocation5], 0  ;;  %s1571_s0 = inlined_call_operand.hbm [shape: bf16[128,128], index: 0, kind: input, shape index: {}]   ;;  %s1572_s1 = inlined_call_operand.hbm [shape: bf16[128,128], index: 1, kind: input, shape index: {}]   ;;  %s1573_s2 = inlined_call_operand.vmem [shape: f32[128,1], index: 2, kind: output, shape index: {}]  }
   0x1   :  { %9 = vsyncpa [#allocation5 + $0x1], 0 }
   0x2   :  { %10 = vsyncpa [#allocation7], 0  ;;  %s1268_s9 = smov 0   ;;  %s1270_s10 = smov 0  }
   0x3   :  { %s1272_s11 = smov 0   ;;  %s1274_s12 = smov 0  }
   0x4   :  { %s1276_s13 = smov 0   ;;  %s1278_s14 = smov 0  }
   0x5 LB: > { %s908_s15 = sadd.s32 4294967295, %s1245_s14   ;;  %p48_p0 = scmp.ne.s32.totalorder %s1229_s10, %s1225_s9  ;;  %s1245_s14 = sphi %s1278_s14, %s16_s14   ;;  %s1241_s13 = sphi %s1276_s13, %s1582_s13   ;;  %s1237_s12 = sphi %s1274_s12, %s1581_s12   ;;  %s1233_s11 = sphi %s1272_s11, %s1580_s11   ;;  %s1229_s10 = sphi %s1270_s10, %s1579_s10   ;;  %s1225_s9 = sphi %s1268_s9, %s1578_s9  }
   0x6   : > { %p1298_p1 = scmp.eq.s32.totalorder %s908_s15, 0  ;;  %p910_p2 = scmp.ge.s32.totalorder %s1245_s14, 1 }
   0x7   : > { %p111_p3 = scmp.lt.s32.totalorder %s1245_s14, 3  ;;  %s125_s20 = sshll.u32 %s1572_s1, 4  ;;  %s126_s20 = int_to_ptr.hbm [resolvable:$true] %s125_s20 }
   0x8   : > { %p1306_p4 = por %p1298_p1, %p48_p0  ;;  %s1247_s22 = smov [#allocation6]  }
   0x9   : > { %p1313_p5 = pnand %p910_p2, %p111_p3  ;;  %s127_s23 = sshll.u32 %s1247_s22, 4  ;;  %s128_s23 = int_to_ptr.vmem [resolvable:$true] %s127_s23 }
   0xa   : > { %s1248_s24 = smov 64   ;;  %s1249_s25 = smov 4  }
   0xb   : > { %p1015_p6 = pneg %p1313_p5  ;;  %s28_s26 = sadd.s32 1, %s1241_s13 }
   0xc   : > { %p30_p8 = scmp.ge.s32.totalorder %s28_s26, 2  ;;  %p42_p9 = scmp.ne.s32.totalorder %s1233_s11, %s1229_s10 }
   0xd   : > { %p1016_p7 = pnand %p1015_p6, %p1298_p1  ;;  %p43_p10 = scmp.eq.s32.totalorder %s1245_s14, 0 }
   0xe   : > { %s1584_s26 = smov (%p30_p8, %s28_s26), 0  ;;  %s35_s27 = sadd.s32 1, %s1233_s11 }
   0xf   : > { %1018 = dma.hbm_to_vmem [thread:$0]  (!%p1016_p7), %s126_s20, 1024, %s128_s23, [#allocation7], %s1248_s24, %s1248_s24, %s1249_s25  }
  0x10   : > { %p1328_p11 = por %p43_p10, %p42_p9  ;;  %s32_s29 = ssub.s32 %s1241_s13, %s1584_s26 }
  0x11   : > { %s141_s30 = sand.u32 1, %s1233_s11   ;;  %p33_p12 = scmp.eq.s32.totalorder %s32_s29, 0 }
  0x12   : > { %p1024_p13 = scmp.lt.s32.totalorder %s1245_s14, 2  ;;  %s913_s3 = sshll.u32 %s141_s30, 5 }
  0x13   : > { %s972_s4 = sshll.u32 %s1241_s13, 5  ;;  %s145_s15 = scalar_lea.vmem [#allocation4], %s913_s3 }
  0x14   : > { %s1338_s5 = scalar_select %p33_p12, %s1233_s11, %s35_s27  }
  0x15   : > { %s150_s8 = scalar_lea.hbm %s1571_s0, %s972_s4  ;;  %s153_s18 = sshll.u32 %s145_s15, 4  ;;  %s154_s18 = int_to_ptr.vmem [resolvable:$true] %s153_s18 }
  0x16   : > { %s151_s9 = sshll.u32 %s150_s8, 4  ;;  %p1020_p0 = pnand %p1024_p13, %p1328_p11  ;;  %s152_s9 = int_to_ptr.hbm [resolvable:$true] %s151_s9 }
  0x17   : > { %s142_s19 = scalar_lea.sflag [#allocation5], %s141_s30  ;;  %165 = sbr.rel (%p1313_p5) target bundleno = 636 (0x27c), region = 28 }
  0x18   : > { %1022 = dma.hbm_to_vmem [thread:$0]  (!%p1020_p0), %s152_s9, 512, %s154_s18, %s142_s19, %s1248_s24, %s1248_s24, %s1249_s25  }
  0x19   : > { %s167_s20 = sand.u32 (!%p1313_p5), 1, %s1229_s10  }
  0x1a   : > { %s917_s22 = sshll.u32 (!%p1313_p5), %s167_s20, 5  ;;  %s168_s23 = scalar_lea.sflag (!%p1313_p5), [#allocation5], %s167_s20 }
  0x1b   : > { %s1348_s27 = scalar_lea.vmem (!%p1313_p5), [#allocation4], %s917_s22 }
  0x1c   : > { %1216 = dma.done.wait (%p1306_p4), %s168_s23, 512  }
  0x1d   : > { %1218 = vsyncadd (%p1306_p4), %s168_s23, 4294966784 }
  0x1e   : > { %1220 = dma.done.wait (%p1298_p1), [#allocation7], 1024  }
  0x1f   : > { %1222 = vsyncadd (%p1298_p1), [#allocation7], 4294966272  ;;  %v984_v0 = vld [vmem:[#allocation6 + $0x38] sm:$0xff]  ;;  %v983_v1 = vld [vmem:[#allocation6 + $0x30] sm:$0xff]  ;;  %v364_v12 = vlaneseq  ;;  %s969_s16 = sshll.u32 %s1237_s12, 6  ;;  %vm210_vm0 = vcmask 7168  }
  0x20   : > { %323 = vmatpush.bf16.xpose.msra.mxu0 %v984_v0  ;;  %985 = vmatpush.bf16.xpose.msra.mxu1 %v984_v0  ;;  %v982_v2 = vld [vmem:[#allocation6 + $0x28] sm:$0xff]  ;;  %v981_v3 = vld [vmem:[#allocation6 + $0x20] sm:$0xff]  ;;  %v980_v4 = vld [vmem:[#allocation6 + $0x18] sm:$0xff]  ;;  %v373_v15 = vstv %s969_s16  ;;  %v1250_v16 = vmov -1e+30   ;;  %v1251_v48 = vmov 0  }
  0x21   : > { %986 = vmatpush.bf16.xpose.msra.mxu2 %v984_v0  ;;  %987 = vmatpush.bf16.xpose.msra.mxu3 %v984_v0  ;;  %v979_v5 = vld [vmem:[#allocation6 + $0x10] sm:$0xff]  ;;  %v978_v6 = vld [vmem:[#allocation6 + $0x8] sm:$0xff]  ;;  %v977_v7 = vld [vmem:[#allocation6] sm:$0xff]  ;;  %v365_v13 = vshrl.u32 %v364_v12, 7  ;;  %213 = vst.msk [vmem:[#allocation2 + $0x10] sm:$0xff] %vm210_vm0, %v1250_v16  ;;  %v383_v18 = vand.u32 127, %v364_v12 }
  0x22   : > { %v973_v8 = vld [vmem:[%s1348_s27] sm:$0xff]  ;;  %v974_v9 = vld [vmem:[%s1348_s27 + $0x8] sm:$0xff]  ;;  %v975_v10 = vld [vmem:[%s1348_s27 + $0x10] sm:$0xff]  ;;  %211 = vst.msk [vmem:[#allocation2] sm:$0xff] %vm210_vm0, %v1250_v16  ;;  %1081 = vset.pattern.permute.xlu1 %v1251_v48  ;;  %1080 = vset.pattern.permute.xlu2 %v1251_v48  ;;  %v1252_v49 = vmov 0.0   ;;  %s919_s17 = sshll.u32 %s1237_s12, 3 }
  0x23   : > { %v976_v11 = vld [vmem:[%s1348_s27 + $0x18] sm:$0xff]  ;;  %v367_v14 = vadd.s32 16, %v365_v13  ;;  %212 = vst.msk [vmem:[#allocation2 + $0x8] sm:$0xff] %vm210_vm0, %v1250_v16  ;;  %v374_v19 = vadd.s32 %v373_v15, %v365_v13  ;;  %v369_v20 = vadd.s32 32, %v365_v13  ;;  %vm394_vm2 = vcmp.ge.s32.totalorder %v383_v18, 16  ;;  %1082 = vset.pattern.permute.xlu0 %v1251_v48  ;;  %p201_p1 = scmp.lt.s32.totalorder %s919_s17, 15 }
  0x24   : > { %214 = vst.msk [vmem:[#allocation2 + $0x18] sm:$0xff] %vm210_vm0, %v1250_v16  ;;  %v371_v21 = vadd.s32 48, %v365_v13  ;;  %v368_v22 = vadd.s32 24, %v365_v13  ;;  %v366_v30 = vadd.s32 8, %v365_v13  ;;  %v370_v31 = vadd.s32 40, %v365_v13 }
  0x25   : > { %v376_v17 = vadd.s32 %v373_v15, %v367_v14  ;;  %215 = vst.msk [vmem:[#allocation2 + $0x20] sm:$0xff] %vm210_vm0, %v1250_v16  ;;  %vm386_vm3 = vcmp.eq.s32.totalorder %v374_v19, %v383_v18  ;;  %v378_v23 = vadd.s32 %v373_v15, %v369_v20  ;;  %v372_v32 = vadd.s32 56, %v365_v13  ;;  %s1586_s17 = smov (!%p201_p1, %s919_s17), 15 }
  0x26   : > { %216 = vst.msk [vmem:[#allocation2 + $0x28] sm:$0xff] %vm210_vm0, %v1250_v16  ;;  %vm395_vm5 = vmor %vm386_vm3, %vm394_vm2  ;;  %v380_v24 = vadd.s32 %v373_v15, %v371_v21  ;;  %v377_v25 = vadd.s32 %v373_v15, %v368_v22  ;;  %v375_v33 = vadd.s32 %v373_v15, %v366_v30  ;;  %v379_v34 = vadd.s32 %v373_v15, %v370_v31  ;;  %s920_s21 = sshll.u32 %s1586_s17, 3 }
  0x27   : > { %217 = vst.msk [vmem:[#allocation2 + $0x30] sm:$0xff] %vm210_vm0, %v1250_v16  ;;  %vm388_vm1 = vcmp.eq.s32.totalorder %v376_v17, %v383_v18  ;;  %vm390_vm6 = vcmp.eq.s32.totalorder %v378_v23, %v383_v18  ;;  %v381_v37 = vadd.s32 %v373_v15, %v372_v32  ;;  %s1514_s25 = scalar_lea.vmem %s1573_s2, %s920_s21 }
  0x28   : > { %324 = vmatpush.bf16.xpose.msra.mxu0 %v983_v1  ;;  %988 = vmatpush.bf16.xpose.msra.mxu1 %v983_v1  ;;  %218 = vst.msk [vmem:[#allocation2 + $0x38] sm:$0xff] %vm210_vm0, %v1250_v16  ;;  %vm397_vm4 = vmor %vm388_vm1, %vm394_vm2  ;;  %vm392_vm7 = vcmp.eq.s32.totalorder %v380_v24, %v383_v18  ;;  %vm389_vm8 = vcmp.eq.s32.totalorder %v377_v25, %v383_v18  ;;  %v1411_v50 = vld [vmem:[#allocation2 + $0x10] sm:$0xff] }
  0x29   : > { %989 = vmatpush.bf16.xpose.msra.mxu2 %v983_v1  ;;  %990 = vmatpush.bf16.xpose.msra.mxu3 %v983_v1  ;;  %vm399_vm9 = vmor %vm390_vm6, %vm394_vm2  ;;  %vm387_vm12 = vcmp.eq.s32.totalorder %v375_v33, %v383_v18  ;;  %vm391_vm13 = vcmp.eq.s32.totalorder %v379_v34, %v383_v18  ;;  %vm393_vm14 = vcmp.eq.s32.totalorder %v381_v37, %v383_v18  ;;  %v1413_v51 = vld [vmem:[#allocation2] sm:$0xff] }
  0x2a   : > { %vm401_vm10 = vmor %vm392_vm7, %vm394_vm2  ;;  %219 = vst.msk [vmem:[#allocation3] sm:$0xff] %vm210_vm0, %v1252_v49 }
  0x2b   : > { %vm398_vm11 = vmor %vm389_vm8, %vm394_vm2  ;;  %220 = vst.msk [vmem:[#allocation3 + $0x8] sm:$0xff] %vm210_vm0, %v1252_v49  ;;  %v1433_v59 = vld [vmem:[#allocation2 + $0x18] sm:$0xff] }
  0x2c   : > { %vm396_vm15 = vmor %vm387_vm12, %vm394_vm2  ;;  %221 = vst.msk [vmem:[#allocation3 + $0x10] sm:$0xff] %vm210_vm0, %v1252_v49  ;;  %v1431_v58 = vld [vmem:[#allocation2 + $0x20] sm:$0xff] }
  0x2d   : > { %vm400_vm1 = vmor %vm391_vm13, %vm394_vm2  ;;  %222 = vst.msk [vmem:[#allocation3 + $0x18] sm:$0xff] %vm210_vm0, %v1252_v49 }
  0x2e   : > { %vm402_vm3 = vmor %vm393_vm14, %vm394_vm2  ;;  %223 = vst.msk [vmem:[#allocation3 + $0x20] sm:$0xff] %vm210_vm0, %v1252_v49  ;;  %v1435_v60 = vld [vmem:[#allocation2 + $0x30] sm:$0xff] }
  0x2f   : > { %224 = vst.msk [vmem:[#allocation3 + $0x28] sm:$0xff] %vm210_vm0, %v1252_v49 }
  0x30   : > { %325 = vmatpush.bf16.xpose.msra.mxu0 %v982_v2  ;;  %991 = vmatpush.bf16.xpose.msra.mxu1 %v982_v2  ;;  %225 = vst.msk [vmem:[#allocation3 + $0x30] sm:$0xff] %vm210_vm0, %v1252_v49 }
  0x31   : > { %992 = vmatpush.bf16.xpose.msra.mxu2 %v982_v2  ;;  %993 = vmatpush.bf16.xpose.msra.mxu3 %v982_v2  ;;  %226 = vst.msk [vmem:[#allocation3 + $0x38] sm:$0xff] %vm210_vm0, %v1252_v49 }
  0x38   : > { %326 = vmatpush.bf16.xpose.msra.mxu0 %v981_v3  ;;  %994 = vmatpush.bf16.xpose.msra.mxu1 %v981_v3 }
  0x39   : > { %995 = vmatpush.bf16.xpose.msra.mxu2 %v981_v3  ;;  %996 = vmatpush.bf16.xpose.msra.mxu3 %v981_v3 }
  0x40   : > { %327 = vmatpush.bf16.xpose.msra.mxu0 %v980_v4  ;;  %997 = vmatpush.bf16.xpose.msra.mxu1 %v980_v4 }
  0x41   : > { %998 = vmatpush.bf16.xpose.msra.mxu2 %v980_v4  ;;  %999 = vmatpush.bf16.xpose.msra.mxu3 %v980_v4 }
  0x48   : > { %328 = vmatpush.bf16.xpose.msra.mxu0 %v979_v5  ;;  %1000 = vmatpush.bf16.xpose.msra.mxu1 %v979_v5 }
  0x49   : > { %1001 = vmatpush.bf16.xpose.msra.mxu2 %v979_v5  ;;  %1002 = vmatpush.bf16.xpose.msra.mxu3 %v979_v5 }
  0x50   : > { %329 = vmatpush.bf16.xpose.msra.mxu0 %v978_v6  ;;  %1003 = vmatpush.bf16.xpose.msra.mxu1 %v978_v6 }
  0x51   : > { %1004 = vmatpush.bf16.xpose.msra.mxu2 %v978_v6  ;;  %1005 = vmatpush.bf16.xpose.msra.mxu3 %v978_v6  ;;  %v1459_v6 = vld [vmem:[#allocation2 + $0x28] sm:$0xff] }
  0x58   : > { %330 = vmatpush.bf16.xpose.msra.mxu0 %v977_v7  ;;  %1006 = vmatpush.bf16.xpose.msra.mxu1 %v977_v7 }
  0x59   : > { %1007 = vmatpush.bf16.xpose.msra.mxu2 %v977_v7  ;;  %1008 = vmatpush.bf16.xpose.msra.mxu3 %v977_v7  ;;  %v1461_v7 = vld [vmem:[#allocation2 + $0x38] sm:$0xff] }
  0x5f   : > { %331 = vmatmul.bf16.vlgmr.msra.gmra.mxu0 %v973_v8  ;;  %336 = vmatmul.bf16.vlgmr.msra.gmra.mxu1 %v974_v9  ;;  %v1463_v8 = vld [vmem:[#allocation2 + $0x8] sm:$0xff] }
  0x60   : > { %341 = vmatmul.bf16.vlgmr.msra.gmra.mxu2 %v975_v10  ;;  %346 = vmatmul.bf16.vlgmr.msra.gmra.mxu3 %v976_v11 }
  0xdc   : > { %v332_v26 = vpop.f32.mrf.mxu0  ;;  %v337_v27 = vpop.f32.mrf.mxu1 }
  0xdd   : > { %v1373_v28 = vsel %vm397_vm4, -1e+30, %v337_v27  ;;  %v1375_v29 = vsel %vm395_vm5, -1e+30, %v332_v26 }
  0xde   : > { %423 = vmax.xlane.f32.xlu1 %v1373_v28  ;;  %419 = vmax.xlane.f32.xlu0 %v1375_v29 }
  0xe3   : > { %v342_v35 = vpop.f32.mrf.mxu2  ;;  %v347_v36 = vpop.f32.mrf.mxu3 }
  0xe4   : > { %v1382_v38 = vsel %vm399_vm9, -1e+30, %v342_v35  ;;  %v339_v39 = vpop.f32.mrf.mxu1  ;;  %v1384_v40 = vsel %vm401_vm10, -1e+30, %v347_v36  ;;  %v334_v42 = vpop.f32.mrf.mxu0 }
  0xe5   : > { %427 = vmax.xlane.f32.xlu2 %v1382_v38  ;;  %v1387_v41 = vsel %vm398_vm11, -1e+30, %v339_v39  ;;  %v1399_v47 = vsel %vm396_vm15, -1e+30, %v334_v42 }
  0xe6   : > { %425 = vmax.xlane.f32.xlu1 %v1387_v41  ;;  %431 = vmax.xlane.f32.xlu0 %v1384_v40 }
  0xeb   : > { %v344_v43 = vpop.f32.mrf.mxu2  ;;  %v349_v44 = vpop.f32.mrf.mxu3 }
  0xec   : > { %v1394_v45 = vsel %vm400_vm1, -1e+30, %v344_v43  ;;  %v1397_v46 = vsel %vm402_vm3, -1e+30, %v349_v44 }
  0xed   : > { %429 = vmax.xlane.f32.xlu2 %v1394_v45 }
  0xee   : > { %433 = vmax.xlane.f32.xlu1 %v1397_v46  ;;  %421 = vmax.xlane.f32.xlu0 %v1399_v47 }
 0x151   : > { %v424_v52 = vpop.xlane.xlu1 %423  ;;  %v420_v53 = vpop.xlane.xlu0 %419 }
 0x152   : > { %v1416_v54 = vmax.f32 %v1411_v50, %v424_v52  ;;  %v1419_v55 = vmax.f32 %v1413_v51, %v420_v53 }
 0x154   : > { %v453_v56 = vsub.f32 %v1411_v50, %v1416_v54  ;;  %582 = vst.msk [vmem:[#allocation2 + $0x10] sm:$0xff] %vm210_vm0, %v1416_v54  ;;  %v451_v57 = vsub.f32 %v1413_v51, %v1419_v55  ;;  %495 = vperm.xlu1 %1081, %v1416_v54   ;;  %485 = vperm.xlu2 %1080, %v1419_v55  }
 0x155   : > { %580 = vst.msk [vmem:[#allocation2] sm:$0xff] %vm210_vm0, %v1419_v55 }
 0x158   : > { %v428_v61 = vpop.xlane.xlu2 %427 }
 0x159   : > { %v1438_v62 = vmax.f32 %v1431_v58, %v428_v61  ;;  %v426_v63 = vpop.xlane.xlu1 %425  ;;  %v432_v0 = vpop.xlane.xlu0 %431 }
 0x15a   : > { %v1441_v1 = vmax.f32 %v1433_v59, %v426_v63  ;;  %v1444_v2 = vmax.f32 %v1435_v60, %v432_v0 }
 0x15b   : > { %v455_v3 = vsub.f32 %v1431_v58, %v1438_v62  ;;  %584 = vst.msk [vmem:[#allocation2 + $0x20] sm:$0xff] %vm210_vm0, %v1438_v62 }
 0x15c   : > { %v454_v4 = vsub.f32 %v1433_v59, %v1441_v1  ;;  %583 = vst.msk [vmem:[#allocation2 + $0x18] sm:$0xff] %vm210_vm0, %v1441_v1  ;;  %v457_v5 = vsub.f32 %v1435_v60, %v1444_v2  ;;  %505 = vperm.xlu2 %1080, %v1438_v62  }
 0x15d   : > { %586 = vst.msk [vmem:[#allocation2 + $0x30] sm:$0xff] %vm210_vm0, %v1444_v2  ;;  %v467_v61 = vmul.f32 1.442695, %v455_v3 }
 0x15e   : > { %v471_v59 = vmul.f32 1.442695, %v457_v5 }
 0x160   : > { %v430_v9 = vpop.xlane.xlu2 %429 }
 0x161   : > { %v1466_v10 = vmax.f32 %v1459_v6, %v430_v9  ;;  %v434_v11 = vpop.xlane.xlu1 %433  ;;  %v422_v12 = vpop.xlane.xlu0 %421 }
 0x162   : > { %v1469_v13 = vmax.f32 %v1461_v7, %v434_v11  ;;  %v1472_v14 = vmax.f32 %v1463_v8, %v422_v12 }
 0x163   : > { %v456_v15 = vsub.f32 %v1459_v6, %v1466_v10  ;;  %585 = vst.msk [vmem:[#allocation2 + $0x28] sm:$0xff] %vm210_vm0, %v1466_v10  ;;  %510 = vperm.xlu1 %1081, %v1466_v10   ;;  %v465_v6 = vmul.f32 1.442695, %v454_v4 }
 0x164   : > { %v458_v16 = vsub.f32 %v1461_v7, %v1469_v13  ;;  %587 = vst.msk [vmem:[#allocation2 + $0x38] sm:$0xff] %vm210_vm0, %v1469_v13  ;;  %v452_v17 = vsub.f32 %v1463_v8, %v1472_v14  ;;  %490 = vperm.xlu0 %1082, %v1472_v14   ;;  %500 = vperm.xlu2 %1080, %v1441_v1  }
 0x165   : > { %581 = vst.msk [vmem:[#allocation2 + $0x8] sm:$0xff] %vm210_vm0, %v1472_v14  ;;  %v448_v14 = vld [vmem:[#allocation3 + $0x28] sm:$0xff] }
 0x16b   : > { %520 = vperm.xlu1 %1081, %v1469_v13  }
 0x16c   : > { %515 = vperm.xlu2 %1080, %v1444_v2  }
 0x1ae   : > { %v486_v18 = vpop.permute.xlu2 %485 }
 0x1af   : > { %v523_v19 = vsub.f32 %v1375_v29, %v486_v18  ;;  %v447_v18 = vld [vmem:[#allocation3 + $0x20] sm:$0xff] }
 0x1b1   : > { %v531_v20 = vmul.f32 1.442695, %v523_v19 }
 0x1b3   : > { %1083 = vpow2.f32 %v531_v20 }
 0x1b6   : > { %v506_v21 = vpop.permute.xlu2 %505 }
 0x1b7   : > { %v527_v22 = vsub.f32 %v1382_v38, %v506_v21  ;;  %v795_v21 = vld [vmem:[#allocation2] sm:$0xff] }
 0x1b9   : > { %v1084_v23 = vpop.eup %1083  ;;  %v539_v24 = vmul.f32 1.442695, %v527_v22 }
 0x1ba   : > { %547 = vadd.xlane.f32.xlu0 %v1084_v23 }
 0x1bb   : > { %1085 = vpow2.f32 %v539_v24 }
 0x1be   : > { %v501_v29 = vpop.permute.xlu2 %500 }
 0x1bf   : > { %v526_v38 = vsub.f32 %v1387_v41, %v501_v29  ;;  %v473_v29 = vmul.f32 1.442695, %v458_v16  ;;  %v797_v16 = vld [vmem:[#allocation2 + $0x10] sm:$0xff] }
 0x1c1   : > { %v1086_v25 = vpop.eup %1085  ;;  %v537_v42 = vmul.f32 1.442695, %v526_v38  ;;  %v450_v38 = vld [vmem:[#allocation3 + $0x38] sm:$0xff] }
 0x1c2   : > { %555 = vadd.xlane.f32.xlu0 %v1086_v25  ;;  %v469_v25 = vmul.f32 1.442695, %v456_v15 }
 0x1c6   : > { %v496_v26 = vpop.permute.xlu1 %495  ;;  %v516_v44 = vpop.permute.xlu2 %515 }
 0x1c7   : > { %v525_v27 = vsub.f32 %v1373_v28, %v496_v26 }
 0x1c9   : > { %v535_v30 = vmul.f32 1.442695, %v525_v27  ;;  %v461_v27 = vmul.f32 1.442695, %v452_v17  ;;  %v444_v17 = vld [vmem:[#allocation3 + $0x8] sm:$0xff] }
 0x1cb   : > { %1087 = vpow2.f32 %v535_v30 }
 0x1d1   : > { %v1088_v31 = vpop.eup %1087 }
 0x1d2   : > { %551 = vadd.xlane.f32.xlu1 %v1088_v31  ;;  %v799_v31 = vld [vmem:[#allocation2 + $0x20] sm:$0xff] }
 0x1d5   : > { %v511_v32 = vpop.permute.xlu1 %510 }
 0x1d6   : > { %v528_v33 = vsub.f32 %v1394_v45, %v511_v32  ;;  %v491_v34 = vpop.permute.xlu0 %490  ;;  %v529_v45 = vsub.f32 %v1384_v40, %v516_v44  ;;  %v443_v40 = vld [vmem:[#allocation3] sm:$0xff] }
 0x1d7   : > { %v524_v35 = vsub.f32 %v1399_v47, %v491_v34 }
 0x1d8   : > { %v541_v36 = vmul.f32 1.442695, %v528_v33  ;;  %v543_v47 = vmul.f32 1.442695, %v529_v45 }
 0x1d9   : > { %v533_v37 = vmul.f32 1.442695, %v524_v35 }
 0x1da   : > { %1089 = vpow2.f32 %v541_v36 }
 0x1db   : > { %1091 = vpow2.f32 %v533_v37 }
 0x1dd   : > { %v521_v39 = vpop.permute.xlu1 %520 }
 0x1de   : > { %v530_v28 = vsub.f32 %v1397_v46, %v521_v39  ;;  %v459_v46 = vmul.f32 1.442695, %v451_v57  ;;  %v463_v57 = vmul.f32 1.442695, %v453_v56  ;;  %v445_v56 = vld [vmem:[#allocation3 + $0x10] sm:$0xff] }
 0x1e0   : > { %v1090_v43 = vpop.eup %1089  ;;  %v545_v48 = vmul.f32 1.442695, %v530_v28 }
 0x1e1   : > { %v1092_v49 = vpop.eup %1091  ;;  %557 = vadd.xlane.f32.xlu1 %v1090_v43 }
 0x1e2   : > { %1093 = vpow2.f32 %v545_v48  ;;  %549 = vadd.xlane.f32.xlu2 %v1092_v49 }
 0x1e3   : > { %1095 = vpow2.f32 %v537_v42  ;;  %v446_v42 = vld [vmem:[#allocation3 + $0x18] sm:$0xff] }
 0x1e4   : > { %1097 = vpow2.f32 %v543_v47 }
 0x1e5   : > { %1099 = vpow2.f32 %v459_v46 }
 0x1e6   : > { %1101 = vpow2.f32 %v467_v61 }
 0x1e8   : > { %v1094_v52 = vpop.eup %1093 }
 0x1e9   : > { %v1096_v53 = vpop.eup %1095  ;;  %561 = vadd.xlane.f32.xlu0 %v1094_v52  ;;  %v449_v52 = vld [vmem:[#allocation3 + $0x30] sm:$0xff] }
 0x1ea   : > { %553 = vadd.xlane.f32.xlu2 %v1096_v53  ;;  %v1098_v41 = vpop.eup %1097 }
 0x1eb   : > { %v1100_v63 = vpop.eup %1099 }
 0x1ec   : > { %v475_v0 = vmul.f32 %v1100_v63, %v443_v40  ;;  %v1102_v12 = vpop.eup %1101 }
 0x1ed   : > { %v479_v19 = vmul.f32 %v1102_v12, %v447_v18  ;;  %v796_v18 = vld [vmem:[#allocation2 + $0x8] sm:$0xff] }
 0x1f2   : > { %559 = vadd.xlane.f32.xlu2 %v1098_v41 }
 0x22d   : > { %v548_v9 = vpop.xlane.xlu0 %547 }
 0x22e   : > { %v563_v11 = vadd.f32 %v548_v9, %v475_v0  ;;  %v800_v9 = vld [vmem:[#allocation2 + $0x28] sm:$0xff] }
 0x230   : > { %572 = vst.msk [vmem:[#allocation3] sm:$0xff] %vm210_vm0, %v563_v11 }
 0x235   : > { %v556_v51 = vpop.xlane.xlu0 %555 }
 0x236   : > { %v567_v55 = vadd.f32 %v556_v51, %v479_v19 }
 0x237   : > { %v771_v58 = vld [vmem:[#allocation3] sm:$0xff] }
 0x238   : > { %1103 = vlog2.f32 %v771_v58  ;;  %576 = vst.msk [vmem:[#allocation3 + $0x20] sm:$0xff] %vm210_vm0, %v567_v55 }
 0x239   : > { %1105 = vpow2.f32 %v463_v57 }
 0x23e   : > { %v1104_v62 = vpop.eup %1103 }
 0x23f   : > { %v780_v3 = vmul.f32 0.6931472, %v1104_v62  ;;  %v775_v20 = vld [vmem:[#allocation3 + $0x20] sm:$0xff]  ;;  %v1106_v50 = vpop.eup %1105  ;;  %v802_v62 = vld [vmem:[#allocation2 + $0x38] sm:$0xff] }
 0x240   : > { %1107 = vlog2.f32 %v775_v20  ;;  %v477_v22 = vmul.f32 %v1106_v50, %v445_v56 }
 0x241   : > { %v803_v54 = vadd.f32 %v795_v21, %v780_v3  ;;  %1109 = vpow2.f32 %v469_v25  ;;  %v798_v21 = vld [vmem:[#allocation2 + $0x18] sm:$0xff] }
 0x242   : > { %1111 = vpow2.f32 %v461_v27 }
 0x243   : > { %812 = vst.msk [vmem:[%s1514_s25] sm:$0xff] %vm210_vm0, %v803_v54 }
 0x245   : > { %v552_v23 = vpop.xlane.xlu1 %551 }
 0x246   : > { %v1108_v24 = vpop.eup %1107  ;;  %v565_v26 = vadd.f32 %v552_v23, %v477_v22  ;;  %v801_v23 = vld [vmem:[#allocation2 + $0x30] sm:$0xff] }
 0x247   : > { %v788_v30 = vmul.f32 0.6931472, %v1108_v24  ;;  %v1110_v8 = vpop.eup %1109 }
 0x248   : > { %574 = vst.msk [vmem:[#allocation3 + $0x10] sm:$0xff] %vm210_vm0, %v565_v26  ;;  %v1112_v15 = vpop.eup %1111  ;;  %v480_v33 = vmul.f32 %v1110_v8, %v448_v14 }
 0x249   : > { %v807_v32 = vadd.f32 %v799_v31, %v788_v30  ;;  %v476_v35 = vmul.f32 %v1112_v15, %v444_v17 }
 0x24b   : > { %816 = vst.msk [vmem:[%s1514_s25 + $0x20] sm:$0xff] %vm210_vm0, %v807_v32 }
 0x24f   : > { %v773_v10 = vld [vmem:[#allocation3 + $0x10] sm:$0xff] }
 0x250   : > { %1113 = vlog2.f32 %v773_v10 }
 0x251   : > { %1115 = vpow2.f32 %v473_v29 }
 0x252   : > { %1117 = vpow2.f32 %v465_v6 }
 0x253   : > { %1119 = vpow2.f32 %v471_v59 }
 0x254   : > { %v558_v34 = vpop.xlane.xlu1 %557 }
 0x255   : > { %v568_v36 = vadd.f32 %v558_v34, %v480_v33  ;;  %v550_v37 = vpop.xlane.xlu2 %549 }
 0x256   : > { %v1114_v7 = vpop.eup %1113  ;;  %v564_v13 = vadd.f32 %v550_v37, %v476_v35 }
 0x257   : > { %v784_v1 = vmul.f32 0.6931472, %v1114_v7  ;;  %577 = vst.msk [vmem:[#allocation3 + $0x28] sm:$0xff] %vm210_vm0, %v568_v36  ;;  %v1116_v4 = vpop.eup %1115 }
 0x258   : > { %573 = vst.msk [vmem:[#allocation3 + $0x8] sm:$0xff] %vm210_vm0, %v564_v13  ;;  %v1118_v39 = vpop.eup %1117  ;;  %v482_v43 = vmul.f32 %v1116_v4, %v450_v38 }
 0x259   : > { %v805_v28 = vadd.f32 %v797_v16, %v784_v1  ;;  %v478_v48 = vmul.f32 %v1118_v39, %v446_v42  ;;  %v1120_v47 = vpop.eup %1119 }
 0x25a   : > { %v481_v53 = vmul.f32 %v1120_v47, %v449_v52 }
 0x25b   : > { %814 = vst.msk [vmem:[%s1514_s25 + $0x10] sm:$0xff] %vm210_vm0, %v805_v28 }
 0x25c   : > { %v562_v44 = vpop.xlane.xlu0 %561 }
 0x25d   : > { %v570_v49 = vadd.f32 %v562_v44, %v482_v43  ;;  %v554_v60 = vpop.xlane.xlu2 %553 }
 0x25e   : > { %v776_v2 = vld [vmem:[#allocation3 + $0x28] sm:$0xff]  ;;  %v566_v5 = vadd.f32 %v554_v60, %v478_v48 }
 0x25f   : > { %1121 = vlog2.f32 %v776_v2  ;;  %v772_v45 = vld [vmem:[#allocation3 + $0x8] sm:$0xff]  ;;  %579 = vst.msk [vmem:[#allocation3 + $0x38] sm:$0xff] %vm210_vm0, %v570_v49 }
 0x260   : > { %1123 = vlog2.f32 %v772_v45  ;;  %575 = vst.msk [vmem:[#allocation3 + $0x18] sm:$0xff] %vm210_vm0, %v566_v5 }
 0x265   : > { %v1122_v41 = vpop.eup %1121  ;;  %v560_v46 = vpop.xlane.xlu2 %559 }
 0x266   : > { %v1124_v61 = vpop.eup %1123  ;;  %v790_v63 = vmul.f32 0.6931472, %v1122_v41  ;;  %v778_v40 = vld [vmem:[#allocation3 + $0x38] sm:$0xff]  ;;  %v569_v0 = vadd.f32 %v560_v46, %v481_v53 }
 0x267   : > { %v782_v11 = vmul.f32 0.6931472, %v1124_v61  ;;  %1125 = vlog2.f32 %v778_v40  ;;  %v774_v12 = vld [vmem:[#allocation3 + $0x18] sm:$0xff] }
 0x268   : > { %v808_v19 = vadd.f32 %v800_v9, %v790_v63  ;;  %1127 = vlog2.f32 %v774_v12  ;;  %578 = vst.msk [vmem:[#allocation3 + $0x30] sm:$0xff] %vm210_vm0, %v569_v0 }
 0x269   : > { %v804_v51 = vadd.f32 %v796_v18, %v782_v11 }
 0x26a   : > { %817 = vst.msk [vmem:[%s1514_s25 + $0x28] sm:$0xff] %vm210_vm0, %v808_v19 }
 0x26b   : > { %813 = vst.msk [vmem:[%s1514_s25 + $0x8] sm:$0xff] %vm210_vm0, %v804_v51 }
 0x26d   : > { %v1126_v55 = vpop.eup %1125 }
 0x26e   : > { %v1128_v57 = vpop.eup %1127  ;;  %v794_v58 = vmul.f32 0.6931472, %v1126_v55 }
 0x26f   : > { %v786_v3 = vmul.f32 0.6931472, %v1128_v57  ;;  %v777_v20 = vld [vmem:[#allocation3 + $0x30] sm:$0xff] }
 0x270   : > { %v810_v50 = vadd.f32 %v802_v62, %v794_v58  ;;  %1129 = vlog2.f32 %v777_v20 }
 0x271   : > { %v806_v54 = vadd.f32 %v798_v21, %v786_v3 }
 0x272   : > { %819 = vst.msk [vmem:[%s1514_s25 + $0x38] sm:$0xff] %vm210_vm0, %v810_v50 }
 0x273   : > { %815 = vst.msk [vmem:[%s1514_s25 + $0x18] sm:$0xff] %vm210_vm0, %v806_v54 }
 0x276   : > { %v1130_v56 = vpop.eup %1129 }
 0x277   : > { %v792_v22 = vmul.f32 0.6931472, %v1130_v56 }
 0x279   : > { %v809_v24 = vadd.f32 %v801_v23, %v792_v22 }
 0x27b   : > { %818 = vst.msk [vmem:[%s1514_s25 + $0x30] sm:$0xff] %vm210_vm0, %v809_v24 }
 0x27c PF: > { %s16_s14 = sadd.s32 1, %s1245_s14   ;;  %s1578_s9 = smov %s1229_s10 }
 0x27d   : > { %p13_p2 = scmp.ge.s32.totalorder %s16_s14, 4   ;;  %s1579_s10 = smov %s1233_s11 }
 0x27e   : > { %s1580_s11 = smov %s1338_s5  ;;  %s1581_s12 = smov %s1241_s13 }
 0x27f   : > { %s1582_s13 = smov %s1584_s26  ;;  %15 = sbr.rel (!%p13_p2) target bundleno = 5 (0x5), region = 89 }
 0x284   :  { %842 = vsyncpa [#allocation5], 1 }
 0x285   :  { %844 = vsyncpa [#allocation5 + $0x1], 1 }
 0x286   :  { %845 = vsyncpa [#allocation7], 1 }

</bundles_post_ra>
